<compile_context>
chip_gen: v5e
topology: v5e:2x2
jax: 0.10.0
libtpu: 0.0.40
codegen_flags: <defaults>
</compile_context>

<pallas_src>
import jax
import jax.numpy as jnp
from jax.experimental import pallas as pl
from jax.experimental.pallas import tpu as pltpu


# --------------------------------------------------------------------------- #
# Kernels
# --------------------------------------------------------------------------- #
def _mlp_kernel(x_ref, w1_ref, b1_ref, w2_ref, b2_ref, x1_ref, x2_ref):
    # fc1: x @ W1 + b1. x is cast to the weight (compute) dtype so the MXU runs
    # its native bf16 path; accumulation stays f32.
    x = x_ref[...].astype(w1_ref.dtype)
    h = jnp.dot(x, w1_ref[...], preferred_element_type=jnp.float32)
    h = h + b1_ref[...]                                # (tb, H) + (1, H), f32
    x1_ref[...] = h.astype(x1_ref.dtype)
    # fc2: fused; the hidden activation never round-trips HBM.
    y = jnp.dot(h.astype(w2_ref.dtype), w2_ref[...],
                preferred_element_type=jnp.float32)
    y = y + b2_ref[...]                                # (tb, Np) + (1, Np), f32
    x2_ref[...] = y.astype(x2_ref.dtype)


def _mlp_kernel_logits_only(x_ref, w1_ref, b1_ref, w2_ref, b2_ref, x2_ref):
    # Variant that skips the x1 HBM writeback (~25-30% less traffic). Biggest
    # relative win on bandwidth-starved v5e.
    x = x_ref[...].astype(w1_ref.dtype)
    h = jnp.dot(x, w1_ref[...], preferred_element_type=jnp.float32)
    h = h + b1_ref[...]
    y = jnp.dot(h.astype(w2_ref.dtype), w2_ref[...],
                preferred_element_type=jnp.float32)
    y = y + b2_ref[...]
    x2_ref[...] = y.astype(x2_ref.dtype)


# --------------------------------------------------------------------------- #
# Tiling heuristic
# --------------------------------------------------------------------------- #
def _pick_tile_b(B: int) -> int:
    """Batch tile: largest multiple of 8 that still yields >=2 grid steps
    (big tiles amortize the ~0.35us per-step overhead: 512-1024 rows reach
    ~85% of HBM roofline vs 63% at 256). Prefer an EVEN step count so v7x
    megacore (core_parallel) keeps both TensorCores busy."""
    if B % 8 != 0:
        return B  # full-array block bypasses the (8,128) sublane rule
    candidates = (2048, 1024, 512, 256, 128, 64, 32, 16, 8)
    for require_even in (True, False):
        for cand in candidates:
            if B % cand == 0:
                steps = B // cand
                if steps >= 2 and (not require_even or steps % 2 == 0):
                    return cand
    return B  # tiny batch: single grid step


# --------------------------------------------------------------------------- #
# Parameter preparation (one-time; keeps per-call padding off the forward path)
# --------------------------------------------------------------------------- #
def prepare_params(w1, b1, w2, b2, *, compute_dtype=jnp.bfloat16):
    """Pads num_classes up to a lane-dense multiple of 128 and casts the
    weights to `compute_dtype` ONCE. Biases stay f32 (added to the f32
    accumulator). Returns ((w1, b1, w2, b2), num_classes).

    w1 : (input_dim, hidden_dim)    -- PyTorch fc1.weight.T
    b1 : (hidden_dim,)
    w2 : (hidden_dim, num_classes)  -- PyTorch fc2.weight.T
    b2 : (num_classes,)
    """
    input_dim, hidden_dim = w1.shape
    hidden_dim2, num_classes = w2.shape
    assert hidden_dim == hidden_dim2

    n_pad = 128 * pl.cdiv(num_classes, 128)
    if n_pad != num_classes:
        w2 = jnp.zeros((hidden_dim, n_pad), w2.dtype).at[:, :num_classes].set(w2)
        b2 = jnp.zeros((n_pad,), b2.dtype).at[:num_classes].set(b2)

    params = (
        w1.astype(compute_dtype),
        b1.reshape(1, hidden_dim).astype(jnp.float32),
        w2.astype(compute_dtype),
        b2.reshape(1, n_pad).astype(jnp.float32),
    )
    return params, num_classes


# --------------------------------------------------------------------------- #
# Forward
# --------------------------------------------------------------------------- #
def embedding_model_forward(x, params, *, num_classes=None, tile_b=None,
                            return_hidden=True, slice_logits=True,
                            out_dtype=None, single_buffer_weights=False,
                            core_parallel=False):
    """Pallas forward for EmbeddingModel.

    x      : (B, input_dim). Streamed at its own dtype; cast to the weight
             dtype inside the kernel. Pass bf16 x to halve the x read too.
    params : output of prepare_params() (padded, compute-dtype weights).
    Returns (x1, x2) if return_hidden else x2. With slice_logits=False the
    padded (B, n_pad) logits are returned so consumers can fuse the slice.
    """
    w1, b1, w2, b2 = params
    if b1.ndim == 1:
        b1 = b1.reshape(1, -1)
    if b2.ndim == 1:
        b2 = b2.reshape(1, -1)

    B, input_dim = x.shape
    hidden_dim = w1.shape[1]
    n_pad = w2.shape[1]
    out_dtype = x.dtype if out_dtype is None else out_dtype

    if tile_b is None:
        tile_b = _pick_tile_b(B)
    assert B % tile_b == 0, "batch must be divisible by tile_b"
    assert tile_b == B or tile_b % 8 == 0, "tile_b must be a multiple of 8"

    grid = (B // tile_b,)

    def _resident(shape):
        # Constant index_map -> block stays VMEM-resident across the grid.
        idx_map = lambda i: (0,) * len(shape)
        if single_buffer_weights:
            return pl.BlockSpec(shape, idx_map, pipeline_mode=pl.Buffered(1))
        return pl.BlockSpec(shape, idx_map)

    in_specs = [
        pl.BlockSpec((tile_b, input_dim), lambda i: (i, 0)),  # x tile (streamed)
        _resident((input_dim, hidden_dim)),                   # W1
        _resident((1, hidden_dim)),                           # b1 (f32)
        _resident((hidden_dim, n_pad)),                       # W2 (lane padded)
        _resident((1, n_pad)),                                # b2 (f32, padded)
    ]

    if return_hidden:
        kernel = _mlp_kernel
        out_shape = (jax.ShapeDtypeStruct((B, hidden_dim), out_dtype),
                     jax.ShapeDtypeStruct((B, n_pad), out_dtype))
        out_specs = [pl.BlockSpec((tile_b, hidden_dim), lambda i: (i, 0)),
                     pl.BlockSpec((tile_b, n_pad), lambda i: (i, 0))]
    else:
        kernel = _mlp_kernel_logits_only
        out_shape = (jax.ShapeDtypeStruct((B, n_pad), out_dtype),)
        out_specs = [pl.BlockSpec((tile_b, n_pad), lambda i: (i, 0))]

    # VMEM budget from the ACTUAL per-stream dtypes (bf16 weights, f32/bf16
    # activations), with headroom; capped under v7x's 64 MiB physical VMEM.
    x_sz = jnp.dtype(x.dtype).itemsize
    w_sz = jnp.dtype(w1.dtype).itemsize
    o_sz = jnp.dtype(out_dtype).itemsize
    wbufs = 1 if single_buffer_weights else 2
    stream_bytes = 2 * tile_b * (
        input_dim * x_sz
        + (hidden_dim * o_sz if return_hidden else 0)
        + n_pad * o_sz)
    weight_bytes = wbufs * (
        (input_dim * hidden_dim + hidden_dim * n_pad) * w_sz
        + (hidden_dim + n_pad) * 4)
    need = stream_bytes + weight_bytes
    vmem_limit = int(min(max(int(1.5 * need) + (2 << 20), 32 << 20), 64 << 20))

    flops = 2 * B * input_dim * hidden_dim + 2 * B * hidden_dim * n_pad
    bytes_accessed = (
        B * input_dim * x_sz
        + (input_dim * hidden_dim + hidden_dim * n_pad) * w_sz
        + (hidden_dim + n_pad) * 4
        + B * n_pad * o_sz
        + (B * hidden_dim * o_sz if return_hidden else 0))

    if core_parallel:
        # v7x megacore: split the batch grid across the two TensorCores.
        dim_sems = (pltpu.CORE_PARALLEL,)
    else:
        dim_sems = ("parallel",)

    outs = pl.pallas_call(
        kernel,
        out_shape=out_shape,
        grid_spec=pltpu.PrefetchScalarGridSpec(
            num_scalar_prefetch=0,
            grid=grid,
            in_specs=in_specs,
            out_specs=out_specs,
        ),
        compiler_params=pltpu.CompilerParams(
            dimension_semantics=dim_sems,
            vmem_limit_bytes=vmem_limit,
        ),
        cost_estimate=pl.CostEstimate(
            flops=flops, transcendentals=0, bytes_accessed=bytes_accessed),
    )(x, w1, b1, w2, b2)

    if return_hidden:
        x1, x2_pad = outs
    else:
        x1 = None
        (x2_pad,) = outs

    if slice_logits and num_classes is not None and num_classes != n_pad:
        # NOTE: this is a separate XLA pass; prefer slice_logits=False and let
        # the consumer (softmax / CE) fuse the slice of the padded logits.
        x2 = x2_pad[:, :num_classes]
    else:
        x2 = x2_pad
    return (x1, x2) if return_hidden else x2


# --------------------------------------------------------------------------- #
# Init mimicking nn.Linear (uniform +/- 1/sqrt(fan_in)), weights pre-transposed
# --------------------------------------------------------------------------- #
def init_params(key, input_dim, hidden_dim, num_classes):
    k1, k2, k3, k4 = jax.random.split(key, 4)
    lim1 = 1.0 / jnp.sqrt(jnp.float32(input_dim))
    lim2 = 1.0 / jnp.sqrt(jnp.float32(hidden_dim))
    w1 = jax.random.uniform(k1, (input_dim, hidden_dim), jnp.float32, -lim1, lim1)
    b1 = jax.random.uniform(k2, (hidden_dim,), jnp.float32, -lim1, lim1)
    w2 = jax.random.uniform(k3, (hidden_dim, num_classes), jnp.float32, -lim2, lim2)
    b2 = jax.random.uniform(k4, (num_classes,), jnp.float32, -lim2, lim2)
    return w1, b1, w2, b2


if __name__ == "__main__":
    input_dim, hidden_dim, num_classes = 256, 128, 2

    key = jax.random.PRNGKey(0)
    kx, kp = jax.random.split(key)
    w1, b1, w2, b2 = init_params(kp, input_dim, hidden_dim, num_classes)

    # f32 params (exact check) and bf16 params (default perf path, loose check).
    params_f32, nc = prepare_params(w1, b1, w2, b2, compute_dtype=jnp.float32)
    params_bf16, _ = prepare_params(w1, b1, w2, b2)  # compute_dtype=bf16

    # batch=8 exercises the single-step fallback; batch=64 the tiled pipelined
    # path (tile_b=32 -> 2 even grid steps) plus the lane-dense padded logits.
    for batch in (8, 64):
        x = jax.random.normal(jax.random.fold_in(kx, batch),
                              (batch, input_dim), jnp.float32)

        # Pure-JAX reference.
        x1_ref = x @ w1 + b1
        x2_ref = x1_ref @ w2 + b2

        # --- f32 streaming path: tight tolerance vs reference ---
        x1, x2 = embedding_model_forward(x, params_f32, num_classes=nc)
        jax.block_until_ready((x1, x2))
        assert x1.shape == (batch, hidden_dim) and x2.shape == (batch, num_classes)
        assert jnp.allclose(x1, x1_ref, atol=1e-5, rtol=1e-5), "f32 x1 mismatch"
        assert jnp.allclose(x2, x2_ref, atol=1e-5, rtol=1e-5), "f32 x2 mismatch"

        # --- bf16 streaming path (default): loose tolerance vs f32 reference ---
        x1b, x2b = embedding_model_forward(x, params_bf16, num_classes=nc)
        jax.block_until_ready((x1b, x2b))
        assert x1b.shape == (batch, hidden_dim) and x2b.shape == (batch, num_classes)
        assert jnp.allclose(x1b, x1_ref, atol=2e-2, rtol=2e-2), "bf16 x1 mismatch"
        assert jnp.allclose(x2b, x2_ref, atol=2e-2, rtol=2e-2), "bf16 x2 mismatch"

        # --- logits-only variant (no x1 writeback) ---
        x2_only = embedding_model_forward(x, params_bf16, num_classes=nc,
                                          return_hidden=False)
        jax.block_until_ready(x2_only)
        assert x2_only.shape == (batch, num_classes)
        assert jnp.allclose(x2_only, x2_ref, atol=2e-2, rtol=2e-2), "logits mismatch"

        # --- padded-logits variant (consumer fuses the slice) ---
        x2_pad = embedding_model_forward(x, params_bf16, num_classes=nc,
                                         return_hidden=False, slice_logits=False)
        jax.block_until_ready(x2_pad)
        assert x2_pad.shape[1] % 128 == 0
        assert jnp.allclose(x2_pad[:, :num_classes], x2_ref, atol=2e-2, rtol=2e-2)

    print("KERNEL_OK")
</pallas_src>

<mosaic_0001>
module attributes {stable_mosaic.version = 11 : i64} {
  func.func @_mlp_kernel(%arg0: i32, %arg1: memref<8x256xf32, #tpu.memory_space<vmem>>, %arg2: memref<256x128xf32, #tpu.memory_space<vmem>>, %arg3: memref<1x128xf32, #tpu.memory_space<vmem>>, %arg4: memref<128x128xf32, #tpu.memory_space<vmem>>, %arg5: memref<1x128xf32, #tpu.memory_space<vmem>>, %arg6: memref<8x128xf32, #tpu.memory_space<vmem>>, %arg7: memref<8x128xf32, #tpu.memory_space<vmem>>) attributes {dimension_semantics = [#tpu.dimension_semantics<parallel>], iteration_bounds = array<i64: 1>, scalar_prefetch = 0 : i64, scratch_operands = 0 : i64, tpu.core_type = #tpu.core_type<tc>, window_params = [{transform_indices = @transform_0, window_bounds = array<i64: 8, 256>}, {pipeline_mode = #tpu.pipeline_mode<synchronous>, transform_indices = @transform_1, window_bounds = array<i64: 256, 128>}, {pipeline_mode = #tpu.pipeline_mode<synchronous>, transform_indices = @transform_2, window_bounds = array<i64: 1, 128>}, {pipeline_mode = #tpu.pipeline_mode<synchronous>, transform_indices = @transform_3, window_bounds = array<i64: 128, 128>}, {pipeline_mode = #tpu.pipeline_mode<synchronous>, transform_indices = @transform_4, window_bounds = array<i64: 1, 128>}, {transform_indices = @transform_5, window_bounds = array<i64: 8, 128>}, {transform_indices = @transform_6, window_bounds = array<i64: 8, 128>}]} {
    %c0 = arith.constant 0 : index
    %c0_0 = arith.constant 0 : index
    %0 = vector.load %arg1[%c0, %c0_0] : memref<8x256xf32, #tpu.memory_space<vmem>>, vector<8x256xf32>
    %c0_1 = arith.constant 0 : index
    %c0_2 = arith.constant 0 : index
    %1 = vector.load %arg2[%c0_1, %c0_2] : memref<256x128xf32, #tpu.memory_space<vmem>>, vector<256x128xf32>
    %cst = arith.constant dense<0.000000e+00> : vector<8x128xf32>
    %2 = tpu.matmul %0, %1, %cst {dimension_numbers = #tpu.dot_dimension_numbers<[1], [0], [0], [1], [0, 0, 1, 1], [], []>} : vector<8x256xf32>, vector<256x128xf32>, vector<8x128xf32> -> vector<8x128xf32>
    %c0_3 = arith.constant 0 : index
    %c0_4 = arith.constant 0 : index
    %3 = vector.load %arg3[%c0_3, %c0_4] : memref<1x128xf32, #tpu.memory_space<vmem>>, vector<1x128xf32>
    %4 = vector.broadcast %3 : vector<1x128xf32> to vector<8x128xf32>
    %5 = arith.addf %2, %4 : vector<8x128xf32>
    %c0_5 = arith.constant 0 : index
    %c0_6 = arith.constant 0 : index
    %6 = vector.load %arg6[%c0_5, %c0_6] : memref<8x128xf32, #tpu.memory_space<vmem>>, vector<8x128xf32>
    tpu.vector_store %arg6[%c0_5, %c0_6], %5 {strides = array<i32>} : memref<8x128xf32, #tpu.memory_space<vmem>>, vector<8x128xf32>,
    %c0_7 = arith.constant 0 : index
    %c0_8 = arith.constant 0 : index
    %7 = vector.load %arg4[%c0_7, %c0_8] : memref<128x128xf32, #tpu.memory_space<vmem>>, vector<128x128xf32>
    %cst_9 = arith.constant dense<0.000000e+00> : vector<8x128xf32>
    %8 = tpu.matmul %5, %7, %cst_9 {dimension_numbers = #tpu.dot_dimension_numbers<[1], [0], [0], [1], [0, 0, 1, 1], [], []>} : vector<8x128xf32>, vector<128x128xf32>, vector<8x128xf32> -> vector<8x128xf32>
    %c0_10 = arith.constant 0 : index
    %c0_11 = arith.constant 0 : index
    %9 = vector.load %arg5[%c0_10, %c0_11] : memref<1x128xf32, #tpu.memory_space<vmem>>, vector<1x128xf32>
    %10 = vector.broadcast %9 : vector<1x128xf32> to vector<8x128xf32>
    %11 = arith.addf %8, %10 : vector<8x128xf32>
    %c0_12 = arith.constant 0 : index
    %c0_13 = arith.constant 0 : index
    %12 = vector.load %arg7[%c0_12, %c0_13] : memref<8x128xf32, #tpu.memory_space<vmem>>, vector<8x128xf32>
    tpu.vector_store %arg7[%c0_12, %c0_13], %11 {strides = array<i32>} : memref<8x128xf32, #tpu.memory_space<vmem>>, vector<8x128xf32>,
    return
  }
  func.func @transform_0(%arg0: i32) -> (i32, i32) {
    %c0_i32 = arith.constant 0 : i32
    %c0_i32_0 = arith.constant 0 : i32
    return %arg0, %c0_i32 : i32, i32
  }
  func.func @transform_1(%arg0: i32) -> (i32, i32) {
    %c0_i32 = arith.constant 0 : i32
    %c0_i32_0 = arith.constant 0 : i32
    %c0_i32_1 = arith.constant 0 : i32
    return %c0_i32, %c0_i32_0 : i32, i32
  }
  func.func @transform_2(%arg0: i32) -> (i32, i32) {
    %c0_i32 = arith.constant 0 : i32
    %c0_i32_0 = arith.constant 0 : i32
    %c0_i32_1 = arith.constant 0 : i32
    return %c0_i32, %c0_i32_0 : i32, i32
  }
  func.func @transform_3(%arg0: i32) -> (i32, i32) {
    %c0_i32 = arith.constant 0 : i32
    %c0_i32_0 = arith.constant 0 : i32
    %c0_i32_1 = arith.constant 0 : i32
    return %c0_i32, %c0_i32_0 : i32, i32
  }
  func.func @transform_4(%arg0: i32) -> (i32, i32) {
    %c0_i32 = arith.constant 0 : i32
    %c0_i32_0 = arith.constant 0 : i32
    %c0_i32_1 = arith.constant 0 : i32
    return %c0_i32, %c0_i32_0 : i32, i32
  }
  func.func @transform_5(%arg0: i32) -> (i32, i32) {
    %c0_i32 = arith.constant 0 : i32
    %c0_i32_0 = arith.constant 0 : i32
    return %arg0, %c0_i32 : i32, i32
  }
  func.func @transform_6(%arg0: i32) -> (i32, i32) {
    %c0_i32 = arith.constant 0 : i32
    %c0_i32_0 = arith.constant 0 : i32
    return %arg0, %c0_i32 : i32, i32
  }
}

</mosaic_0001>

<bundles_post_ra>
// kernel: tpu_custom_call.1
= control target key start
LH: loop header
LB: loop body
LE: loop exit
PB: predicated region body
PF: predicated region fallthrough
CT: control target
= control target key end

     0   :  { %12 = vsyncpa [#allocation3], 0  ;;  %s423_s0 = inlined_call_operand.hbm [shape: f32[8,256], index: 0, kind: input, shape index: {}]   ;;  %s424_s1 = inlined_call_operand.hbm [shape: f32[256,128], index: 1, kind: input, shape index: {}]   ;;  %s425_s2 = inlined_call_operand.vmem [shape: f32[1,128], index: 2, kind: input, shape index: {}]   ;;  %s426_s3 = inlined_call_operand.hbm [shape: f32[128,128], index: 3, kind: input, shape index: {}]   ;;  %s427_s4 = inlined_call_operand.vmem [shape: f32[1,128], index: 4, kind: input, shape index: {}]   ;;  %s428_s5 = inlined_call_operand.hbm [shape: f32[8,128], index: 5, kind: output, shape index: {0}]   ;;  %s429_s6 = inlined_call_operand.hbm [shape: f32[8,128], index: 6, kind: output, shape index: {1}]  }
   0x1   :  { %13 = vsyncpa [#allocation6], 0 }
   0x2   :  { %14 = vsyncpa [#allocation4], 0  ;;  %s31_s23 = sshll.u32 %s424_s1, 4  ;;  %s32_s23 = int_to_ptr.hbm [resolvable:$true] %s31_s23 }
   0x3   :  { %15 = vsyncpa [#allocation10], 0  ;;  %s360_s24 = smov [#allocation5]   ;;  %s21_s28 = sshll.u32 %s423_s0, 4  ;;  %s22_s28 = int_to_ptr.hbm [resolvable:$true] %s21_s28 }
   0x4   :  { %s33_s25 = sshll.u32 %s360_s24, 4  ;;  %s361_s29 = smov 128   ;;  %s34_s25 = int_to_ptr.vmem [resolvable:$true] %s33_s25 }
   0x5   :  { %s362_s30 = smov 8   ;;  %s363_s7 = smov [#allocation2]  }
   0x6   :  { %39 = dma.hbm_to_vmem [thread:$0]  %s32_s23, 4096, %s34_s25, [#allocation6], %s361_s29, %s361_s29, %s362_s30  }
   0x7   :  { %s23_s8 = sshll.u32 %s363_s7, 4  ;;  %s46_s11 = sshll.u32 %s426_s3, 4  ;;  %s24_s8 = int_to_ptr.vmem [resolvable:$true] %s23_s8  ;;  %s47_s11 = int_to_ptr.hbm [resolvable:$true] %s46_s11 }
   0x8   :  { %26 = dma.hbm_to_vmem [thread:$0]  %s22_s28, 256, %s24_s8, [#allocation3]  }
   0x9   :  { %s364_s1 = smov [#allocation7]  }
   0xa   :  { %s48_s12 = sshll.u32 %s364_s1, 4  ;;  %s49_s12 = int_to_ptr.vmem [resolvable:$true] %s48_s12 }
   0xb   :  { %54 = dma.hbm_to_vmem [thread:$0]  %s47_s11, 2048, %s49_s12, [#allocation6], %s361_s29, %s361_s29, %s362_s30  }
   0xc   :  { %352 = dma.done.wait [#allocation3], 256  }
   0xd   :  { %353 = vsyncadd [#allocation3], 4294967040 }
   0xe   :  { %354 = dma.done.wait [#allocation6], 6144  }
   0xf   :  { %355 = vsyncadd [#allocation6], 4294961152  ;;  %v86_v0 = vld [vmem:[#allocation5 + $0x78] sm:$0xff]  ;;  %v85_v1 = vld [vmem:[#allocation5 + $0x70] sm:$0xff]  ;;  %s365_s13 = smov [#allocation8]   ;;  %s196_s17 = sshll.u32 %s428_s5, 4  ;;  %s197_s17 = int_to_ptr.hbm [resolvable:$true] %s196_s17 }
  0x10   :  { %v102_v2 = vld [vmem:[#allocation5 + $0xf8] sm:$0xff]  ;;  %107 = vmatpush.msra.mxu0 %v86_v0  ;;  %v101_v3 = vld [vmem:[#allocation5 + $0xf0] sm:$0xff]  ;;  %v84_v4 = vld [vmem:[#allocation5 + $0x68] sm:$0xff]  ;;  %s194_s14 = sshll.u32 %s365_s13, 4  ;;  %s207_s23 = sshll.u32 %s429_s6, 4  ;;  %s195_s14 = int_to_ptr.vmem [resolvable:$true] %s194_s14  ;;  %s208_s23 = int_to_ptr.hbm [resolvable:$true] %s207_s23 }
  0x11   :  { %127 = vmatpush.msra.mxu1 %v102_v2  ;;  %v100_v5 = vld [vmem:[#allocation5 + $0xe8] sm:$0xff]  ;;  %v83_v6 = vld [vmem:[#allocation5 + $0x60] sm:$0xff]  ;;  %v82_v8 = vld [vmem:[#allocation5 + $0x58] sm:$0xff] }
  0x12   :  { %108 = vmatpush.msra.mxu0 %v85_v1  ;;  %v99_v7 = vld [vmem:[#allocation5 + $0xe0] sm:$0xff]  ;;  %v98_v9 = vld [vmem:[#allocation5 + $0xd8] sm:$0xff]  ;;  %v81_v10 = vld [vmem:[#allocation5 + $0x50] sm:$0xff] }
  0x13   :  { %128 = vmatpush.msra.mxu1 %v101_v3  ;;  %v97_v11 = vld [vmem:[#allocation5 + $0xd0] sm:$0xff]  ;;  %v80_v12 = vld [vmem:[#allocation5 + $0x48] sm:$0xff]  ;;  %v163_v14 = vld [vmem:[#allocation7 + $0x78] sm:$0xff] }
  0x14   :  { %109 = vmatpush.msra.mxu0 %v84_v4  ;;  %v96_v13 = vld [vmem:[#allocation5 + $0xc8] sm:$0xff]  ;;  %v162_v15 = vld [vmem:[#allocation7 + $0x70] sm:$0xff]  ;;  %v79_v16 = vld [vmem:[#allocation5 + $0x40] sm:$0xff]  ;;  %168 = vmatpush.msra.mxu2 %v163_v14 }
  0x15   :  { %129 = vmatpush.msra.mxu1 %v100_v5  ;;  %v95_v17 = vld [vmem:[#allocation5 + $0xc0] sm:$0xff]  ;;  %v161_v18 = vld [vmem:[#allocation7 + $0x68] sm:$0xff]  ;;  %v78_v19 = vld [vmem:[#allocation5 + $0x38] sm:$0xff] }
  0x16   :  { %110 = vmatpush.msra.mxu0 %v83_v6  ;;  %v94_v20 = vld [vmem:[#allocation5 + $0xb8] sm:$0xff]  ;;  %169 = vmatpush.msra.mxu2 %v162_v15  ;;  %v160_v21 = vld [vmem:[#allocation7 + $0x60] sm:$0xff]  ;;  %v77_v22 = vld [vmem:[#allocation5 + $0x30] sm:$0xff] }
  0x17   :  { %130 = vmatpush.msra.mxu1 %v99_v7  ;;  %v93_v23 = vld [vmem:[#allocation5 + $0xb0] sm:$0xff]  ;;  %v159_v24 = vld [vmem:[#allocation7 + $0x58] sm:$0xff]  ;;  %v76_v25 = vld [vmem:[#allocation5 + $0x28] sm:$0xff] }
  0x18   :  { %111 = vmatpush.msra.mxu0 %v82_v8  ;;  %170 = vmatpush.msra.mxu2 %v161_v18  ;;  %v92_v26 = vld [vmem:[#allocation5 + $0xa8] sm:$0xff]  ;;  %v158_v27 = vld [vmem:[#allocation7 + $0x50] sm:$0xff]  ;;  %v75_v28 = vld [vmem:[#allocation5 + $0x20] sm:$0xff] }
  0x19   :  { %131 = vmatpush.msra.mxu1 %v98_v9  ;;  %v91_v29 = vld [vmem:[#allocation5 + $0xa0] sm:$0xff]  ;;  %v157_v30 = vld [vmem:[#allocation7 + $0x48] sm:$0xff]  ;;  %v74_v31 = vld [vmem:[#allocation5 + $0x18] sm:$0xff] }
  0x1a   :  { %112 = vmatpush.msra.mxu0 %v81_v10  ;;  %171 = vmatpush.msra.mxu2 %v160_v21  ;;  %v90_v32 = vld [vmem:[#allocation5 + $0x98] sm:$0xff]  ;;  %v156_v33 = vld [vmem:[#allocation7 + $0x40] sm:$0xff]  ;;  %v73_v34 = vld [vmem:[#allocation5 + $0x10] sm:$0xff] }
  0x1b   :  { %132 = vmatpush.msra.mxu1 %v97_v11  ;;  %v89_v35 = vld [vmem:[#allocation5 + $0x90] sm:$0xff]  ;;  %v155_v36 = vld [vmem:[#allocation7 + $0x38] sm:$0xff]  ;;  %v72_v37 = vld [vmem:[#allocation5 + $0x8] sm:$0xff] }
  0x1c   :  { %113 = vmatpush.msra.mxu0 %v80_v12  ;;  %172 = vmatpush.msra.mxu2 %v159_v24  ;;  %v88_v38 = vld [vmem:[#allocation5 + $0x88] sm:$0xff]  ;;  %v154_v39 = vld [vmem:[#allocation7 + $0x30] sm:$0xff]  ;;  %v71_v40 = vld [vmem:[#allocation5] sm:$0xff] }
  0x1d   :  { %133 = vmatpush.msra.mxu1 %v96_v13  ;;  %v87_v41 = vld [vmem:[#allocation5 + $0x80] sm:$0xff]  ;;  %v69_v42 = vld [vmem:[#allocation2] sm:$0xff]  ;;  %v70_v43 = vld [vmem:[#allocation2 + $0x8] sm:$0xff] }
  0x1e   :  { %114 = vmatpush.msra.mxu0 %v79_v16  ;;  %173 = vmatpush.msra.mxu2 %v158_v27  ;;  %v153_v44 = vld [vmem:[#allocation7 + $0x28] sm:$0xff]  ;;  %v152_v45 = vld [vmem:[#allocation7 + $0x20] sm:$0xff]  ;;  %v151_v46 = vld [vmem:[#allocation7 + $0x18] sm:$0xff] }
  0x1f   :  { %134 = vmatpush.msra.mxu1 %v95_v17  ;;  %v150_v47 = vld [vmem:[#allocation7 + $0x10] sm:$0xff]  ;;  %v149_v48 = vld [vmem:[#allocation7 + $0x8] sm:$0xff]  ;;  %v148_v49 = vld [vmem:[#allocation7] sm:$0xff] }
  0x20   :  { %115 = vmatpush.msra.mxu0 %v78_v19  ;;  %174 = vmatpush.msra.mxu2 %v157_v30  ;;  %v230_v50 = vld [vmem:[%s425_s2] ss:$0 sm:$0xff]  ;;  %s366_s2 = smov [#allocation9]  }
  0x21   :  { %135 = vmatpush.msra.mxu1 %v94_v20  ;;  %v231_v55 = vld [vmem:[%s427_s4] ss:$0 sm:$0xff]  ;;  %s205_s20 = sshll.u32 %s366_s2, 4  ;;  %s206_s20 = int_to_ptr.vmem [resolvable:$true] %s205_s20 }
  0x22   :  { %116 = vmatpush.msra.mxu0 %v77_v22  ;;  %175 = vmatpush.msra.mxu2 %v156_v33 }
  0x23   :  { %136 = vmatpush.msra.mxu1 %v93_v23 }
  0x24   :  { %117 = vmatpush.msra.mxu0 %v76_v25  ;;  %176 = vmatpush.msra.mxu2 %v155_v36 }
  0x25   :  { %137 = vmatpush.msra.mxu1 %v92_v26 }
  0x26   :  { %118 = vmatpush.msra.mxu0 %v75_v28  ;;  %177 = vmatpush.msra.mxu2 %v154_v39 }
  0x27   :  { %138 = vmatpush.msra.mxu1 %v91_v29 }
  0x28   :  { %119 = vmatpush.msra.mxu0 %v74_v31  ;;  %178 = vmatpush.msra.mxu2 %v153_v44 }
  0x29   :  { %139 = vmatpush.msra.mxu1 %v90_v32 }
  0x2a   :  { %120 = vmatpush.msra.mxu0 %v73_v34  ;;  %179 = vmatpush.msra.mxu2 %v152_v45 }
  0x2b   :  { %140 = vmatpush.msra.mxu1 %v89_v35 }
  0x2c   :  { %121 = vmatpush.msra.mxu0 %v72_v37  ;;  %180 = vmatpush.msra.mxu2 %v151_v46 }
  0x2d   :  { %141 = vmatpush.msra.mxu1 %v88_v38 }
  0x2e   :  { %122 = vmatpush.msra.mxu0 %v71_v40  ;;  %181 = vmatpush.msra.mxu2 %v150_v47 }
  0x2f   :  { %142 = vmatpush.msra.mxu1 %v87_v41  ;;  %123 = vmatmul.f32.vlgmr.msra.gmra.mxu0 %v69_v42 }
  0x30   :  { %143 = vmatmul.f32.vlgmr.msra.gmra.mxu1 %v70_v43  ;;  %182 = vmatpush.msra.mxu2 %v149_v48 }
  0x32   :  { %183 = vmatpush.msra.mxu2 %v148_v49 }
  0xac   :  { %v124_v51 = vpop.f32.mrf.mxu0 }
  0xad   :  { %v144_v52 = vpop.f32.mrf.mxu1  ;;  %v125_v53 = vadd.f32 %v230_v50, %v124_v51 }
  0xaf   :  { %v145_v54 = vadd.f32 %v144_v52, %v125_v53 }
  0xb1   :  { %147 = vst [vmem:[#allocation8] sm:$0xff] %v145_v54  ;;  %184 = vmatmul.f32.vlgmr.msra.gmra.mxu2 %v145_v54 }
  0xb2   :  { %199 = dma.vmem_to_hbm [thread:$0]  %s195_s14, 128, %s197_s17, [#allocation4]  }
 0x134   :  { %v185_v56 = vpop.f32.mrf.mxu2 }
 0x135   :  { %v186_v57 = vadd.f32 %v231_v55, %v185_v56 }
 0x137   :  { %188 = vst [vmem:[#allocation9] sm:$0xff] %v186_v57 }
 0x138   :  { %210 = dma.vmem_to_hbm [thread:$0]  %s206_s20, 128, %s208_s23, [#allocation10]  }
 0x139   :  { %356 = dma.done.wait [#allocation4], 128  }
 0x13a   :  { %357 = vsyncadd [#allocation4], 4294967168 }
 0x13b   :  { %358 = dma.done.wait [#allocation10], 128  }
 0x13c   :  { %359 = vsyncadd [#allocation10], 4294967168 }
 0x13d   :  { %219 = vsyncpa [#allocation3], 1 }
 0x13e   :  { %220 = vsyncpa [#allocation6], 1 }
 0x13f   :  { %221 = vsyncpa [#allocation4], 1 }
 0x140   :  { %222 = vsyncpa [#allocation10], 1 }

</bundles_post_ra>
